<compile_context>
chip_gen: v7x
topology: tpu7x:2x2x1
jax: 0.10.0
libtpu: 0.0.40
codegen_flags: <defaults>
</compile_context>

<pallas_src>
import jax
import jax.numpy as jnp
from jax.experimental import pallas as pl
from jax.experimental.pallas import tpu as pltpu


def _copy_kernel(x_ref, o_ref):
    # Pure pass-through copy of one lane-dense tile.
    o_ref[...] = x_ref[...]


# Lane dim: wide multiple of 128 so output stores are unmasked full-lane vst's.
_LANE_CANDIDATES = (4096, 2048, 1024, 512, 256, 128)

# ~4 MiB per tile buffer: in + out, double-buffered ~= 16 MiB, which fits with
# headroom under the explicit 32 MiB scoped-VMEM limit set below on all of
# v5e / v6e / v7x (v7x physical VMEM is 64 MiB, v5e/v6e 128 MiB).
_TARGET_TILE_BYTES = 4 * 1024 * 1024
_VMEM_LIMIT_BYTES = 32 * 1024 * 1024

# Sublane packing granularity per element size (f32 -> 8, bf16 -> 16, i8 -> 32)
# so sub-32-bit tiles stay fully packed per vreg and stores stay unmasked.
_PACK = {4: 8, 2: 16, 1: 32}


def _pallas_copy_2d(x2d):
    """Tiled lane-dense identity copy of a (rows, lane) array via Pallas."""
    rows, lane = x2d.shape
    itemsize = jnp.dtype(x2d.dtype).itemsize
    pack = _PACK.get(itemsize, 8)

    tr = max(pack, (_TARGET_TILE_BYTES // (lane * itemsize)) // pack * pack)
    # Keep >= ~4 grid steps when there is enough work so the "parallel" grid
    # axis can be sharded across v7x's two TensorCores with >=2 tiles per core.
    if rows > 4 * pack:
        quarter = ((-(-rows // 4)) + pack - 1) // pack * pack
        tr = min(tr, quarter)
    tile_rows = min(rows, tr)

    grid = (pl.cdiv(rows, tile_rows),)
    n_bytes = rows * lane * itemsize
    return pl.pallas_call(
        _copy_kernel,
        out_shape=jax.ShapeDtypeStruct(x2d.shape, x2d.dtype),
        grid=grid,
        in_specs=[pl.BlockSpec((tile_rows, lane), lambda i: (i, 0))],
        out_specs=pl.BlockSpec((tile_rows, lane), lambda i: (i, 0)),
        # NOTE: input_output_aliases intentionally dropped.  With a non-donated
        # input, aliasing makes XLA insert a defensive copy of x *and* the
        # kernel copies again (4N bytes instead of 2N).  Plain copy is cheaper
        # in the general case.
        cost_estimate=pl.CostEstimate(
            flops=0, transcendentals=0, bytes_accessed=2 * n_bytes),
        compiler_params=pltpu.CompilerParams(
            dimension_semantics=("parallel",),
            vmem_limit_bytes=_VMEM_LIMIT_BYTES),
    )(x2d)


def unsqueeze_last(x, d=2, force_pallas=False):
    """Pallas equivalent of UnsqueezeLast(d).forward(x)."""
    out_shape = (*x.shape, *([1] * d))
    n = int(x.size)

    if not force_pallas or n == 0:
        # Appending trailing size-1 dims moves zero elements; the optimal
        # "kernel" is no kernel at all (pure metadata reshape, zero HBM bytes).
        return x.reshape(out_shape)

    # Flatten to a lane-dense 2D view (rows, lane), lane a multiple of 128.
    lane = None
    for cand in _LANE_CANDIDATES:
        if n % cand == 0:
            lane = cand
            break

    if lane is not None:
        out2d = _pallas_copy_2d(x.reshape(n // lane, lane))
        return out2d.reshape(out_shape)

    # Awkward sizes: pad the flat array to a multiple of 8*128 so the tiled
    # path stays lane-dense and VMEM-bounded (no single giant (1, n) block),
    # then slice the padding back off.
    n_pad = pl.cdiv(n, 1024) * 1024
    flat = jnp.pad(x.reshape(-1), (0, n_pad - n))
    out_flat = _pallas_copy_2d(flat.reshape(n_pad // 1024, 1024)).reshape(-1)
    return out_flat[:n].reshape(out_shape)


if __name__ == "__main__":
    key = jax.random.PRNGKey(0)
    x = jax.random.normal(key, (2, 4, 16, 16), dtype=jnp.float32)

    # Exercise the Pallas copy path once.
    y = jax.block_until_ready(unsqueeze_last(x, d=2, force_pallas=True))

    # Reference semantics: x.reshape(*x.shape, 1, 1)
    y_ref = x.reshape(*x.shape, 1, 1)
    assert y.shape == (2, 4, 16, 16, 1, 1), y.shape
    assert y.dtype == x.dtype
    assert jnp.array_equal(y, y_ref)

    # Default (recommended) path: pure metadata reshape, zero HBM traffic.
    y_fast = jax.block_until_ready(unsqueeze_last(x, d=2))
    assert y_fast.shape == y_ref.shape
    assert jnp.array_equal(y_fast, y_ref)

    print("KERNEL_OK")
</pallas_src>

<mosaic_0001>
module attributes {stable_mosaic.version = 11 : i64} {
  func.func @_copy_kernel(%arg0: i32, %arg1: memref<1x2048xf32, #tpu.memory_space<vmem>>, %arg2: memref<1x2048xf32, #tpu.memory_space<vmem>>) attributes {dimension_semantics = [#tpu.dimension_semantics<parallel>], iteration_bounds = array<i64: 1>, scalar_prefetch = 0 : i64, scratch_operands = 0 : i64, tpu.core_type = #tpu.core_type<tc>, window_params = [{transform_indices = @transform_0, window_bounds = array<i64: 1, 2048>}, {transform_indices = @transform_1, window_bounds = array<i64: 1, 2048>}]} {
    %c0 = arith.constant 0 : index
    %c0_0 = arith.constant 0 : index
    %0 = vector.load %arg1[%c0, %c0_0] : memref<1x2048xf32, #tpu.memory_space<vmem>>, vector<1x2048xf32>
    %c0_1 = arith.constant 0 : index
    %c0_2 = arith.constant 0 : index
    %1 = vector.load %arg2[%c0_1, %c0_2] : memref<1x2048xf32, #tpu.memory_space<vmem>>, vector<1x2048xf32>
    tpu.vector_store %arg2[%c0_1, %c0_2], %0 {strides = array<i32>} : memref<1x2048xf32, #tpu.memory_space<vmem>>, vector<1x2048xf32>,
    return
  }
  func.func @transform_0(%arg0: i32) -> (i32, i32) {
    %c0_i32 = arith.constant 0 : i32
    %c0_i32_0 = arith.constant 0 : i32
    return %arg0, %c0_i32 : i32, i32
  }
  func.func @transform_1(%arg0: i32) -> (i32, i32) {
    %c0_i32 = arith.constant 0 : i32
    %c0_i32_0 = arith.constant 0 : i32
    return %arg0, %c0_i32 : i32, i32
  }
}

</mosaic_0001>

<bundles_post_ra>
// kernel: tpu_custom_call.1
= control target key start
LH: loop header
LB: loop body
LE: loop exit
PB: predicated region body
PF: predicated region fallthrough
CT: control target
= control target key end

     0   :  { %6 = vsyncpa [#allocation3], 0  ;;  %s126_s0 = inlined_call_operand.hbm [shape: f32[1,2048], index: 0, kind: input, shape index: {}]   ;;  %s127_s1 = inlined_call_operand.hbm [shape: f32[1,2048], index: 1, kind: output, shape index: {}]  }
   0x1   :  { %7 = vsyncpa [#allocation4], 0  ;;  %s90_s6 = smov [#allocation2]   ;;  %s42_s10 = scalar_lea.hbm %s126_s0, 256 }
   0x2   :  { %s14_s7 = sshll.u32 %s90_s6, 4  ;;  %p43_p0 = scmp.ne.s32.totalorder %s126_s0, %s42_s10  ;;  %s15_s7 = int_to_ptr.vmem [resolvable:$true] %s14_s7 }
   0x3   :  { %p46_p1 = scmp.lt.u32.totalorder %s42_s10, %s126_s0 }
   0x5   :  { %p48_p2 = pnand %p46_p1, %p43_p0 }
   0x7   :  { %51 = shalt.err (!%p48_p2)
}
   0x8   :  { %s52_s15 = scalar_lea.vmem %s15_s7, 256  ;;  %p57_p4 = scmp.lt.s32.totalorder %s15_s7, %s15_s7 }
   0x9   :  { %p53_p3 = scmp.ne.s32.totalorder %s15_s7, %s52_s15  ;;  %p58_p5 = scmp.lt.s32.totalorder %s52_s15, %s52_s15 }
   0xb   :  { %p59_p6 = por %p58_p5, %p57_p4 }
   0xd   :  { %p60_p7 = pnand %p59_p6, %p53_p3 }
   0xf   :  { %63 = shalt.err (!%p60_p7)
}
  0x10   :  { %17 = dma.hbm_to_vmem [thread:$0]  %s126_s0, 256, %s15_s7, [#allocation3]  }
  0x11   :  { %86 = dma.done.wait [#allocation3], 256  }
  0x12   :  { %87 = vsyncadd [#allocation3], 4294967040  ;;  %s91_s18 = smov [#allocation5]   ;;  %v21_v0 = vld [vmem:[#allocation2] sm:$0xff]  ;;  %v22_v1 = vld [vmem:[#allocation2 + $0x8] sm:$0xff] }
  0x13   :  { %s31_s19 = sshll.u32 %s91_s18, 4  ;;  %23 = vst [vmem:[#allocation5] sm:$0xff] %v21_v0  ;;  %24 = vst [vmem:[#allocation5 + $0x8] sm:$0xff] %v22_v1  ;;  %s32_s19 = int_to_ptr.vmem [resolvable:$true] %s31_s19 }
  0x14   :  { %s64_s20 = scalar_lea.vmem %s32_s19, 256  ;;  %p69_p9 = scmp.lt.s32.totalorder %s32_s19, %s32_s19 }
  0x15   :  { %p65_p8 = scmp.ne.s32.totalorder %s32_s19, %s64_s20  ;;  %p70_p10 = scmp.lt.s32.totalorder %s64_s20, %s64_s20 }
  0x17   :  { %p71_p11 = por %p70_p10, %p69_p9 }
  0x19   :  { %p72_p12 = pnand %p71_p11, %p65_p8 }
  0x1b   :  { %75 = shalt.err (!%p72_p12)
}
  0x1c   :  { %s76_s0 = scalar_lea.hbm %s127_s1, 256 }
  0x1d   :  { %p77_p13 = scmp.ne.s32.totalorder %s127_s1, %s76_s0  ;;  %p80_p0 = scmp.lt.u32.totalorder %s76_s0, %s127_s1 }
  0x1f   :  { %p82_p1 = pnand %p80_p0, %p77_p13 }
  0x21   :  { %85 = shalt.err (!%p82_p1)
}
  0x22   :  { %34 = dma.vmem_to_hbm [thread:$0]  %s32_s19, 256, %s127_s1, [#allocation4]  }
  0x23   :  { %88 = dma.done.wait [#allocation4], 256  }
  0x24   :  { %89 = vsyncadd [#allocation4], 4294967040 }
  0x25   :  { %38 = vsyncpa [#allocation3], 1 }
  0x26   :  { %39 = vsyncpa [#allocation4], 1 }

</bundles_post_ra>
